<compile_context>
chip_gen: v7x
topology: tpu7x:2x2x1
jax: 0.10.0
libtpu: 0.0.40
codegen_flags: <defaults>
</compile_context>

<pallas_src>
import functools

import jax
import jax.numpy as jnp
from jax.experimental import pallas as pl
from jax.experimental.pallas import tpu as pltpu

LN_EPS = 1e-5


def _round_up(n, m):
    return ((n + m - 1) // m) * m


def skip_block_kernel(x_ref, w1_ref, b1_ref, w2_ref, b2_ref, g_ref, beta_ref,
                      o_ref, *, d_valid, compute_dtype):
    # x_ref: (tm, Dp) row tile; params are full-extent (lane-padded) blocks.
    x_in = x_ref[...]

    # --- MLP 1: Linear(D -> 2D) + SiLU (MXU in compute_dtype, f32 accum) ---
    h = jnp.dot(x_in.astype(compute_dtype), w1_ref[...],
                preferred_element_type=jnp.float32)
    h = h + b1_ref[...].astype(jnp.float32)          # (tm, 2Dp) + (1, 2Dp)
    h = h * jax.nn.sigmoid(h)                        # SiLU, f32 (EUP-friendly)

    # --- MLP 2: Linear(2D -> D) ---
    y = jnp.dot(h.astype(compute_dtype), w2_ref[...],
                preferred_element_type=jnp.float32)
    y = y + b2_ref[...].astype(jnp.float32)          # (tm, Dp) + (1, Dp)

    # --- residual + LayerNorm over the (unpadded) last dim ---
    y = y + x_in.astype(jnp.float32)
    d_pad = y.shape[-1]
    if d_valid == d_pad:
        mean = jnp.mean(y, axis=-1, keepdims=True)
        cent = y - mean
        var = jnp.mean(cent * cent, axis=-1, keepdims=True)
    else:
        # Feature dim was padded to a lane-dense multiple of 128: mask the
        # padded lanes out of the reduction (padded lanes are zero anyway).
        lane = jax.lax.broadcasted_iota(jnp.int32, y.shape, dimension=1)
        mask = lane < d_valid
        inv_d = 1.0 / float(d_valid)
        y = jnp.where(mask, y, 0.0)
        mean = jnp.sum(y, axis=-1, keepdims=True) * inv_d
        cent = jnp.where(mask, y - mean, 0.0)
        var = jnp.sum(cent * cent, axis=-1, keepdims=True) * inv_d

    y_hat = cent * jax.lax.rsqrt(var + LN_EPS)
    out = y_hat * g_ref[...].astype(jnp.float32) + beta_ref[...].astype(jnp.float32)
    o_ref[...] = out.astype(o_ref.dtype)


@functools.partial(jax.jit, static_argnames=("tm", "compute_dtype"))
def skip_block(x, w1, b1, w2, b2, gamma, beta, *, tm=256, compute_dtype=None):
    """x: (..., D).  Returns same shape/dtype as x.

    compute_dtype: dtype fed to the MXU (e.g. jnp.bfloat16). Accumulation,
    SiLU, residual and LayerNorm are always f32.  Defaults to x.dtype.
    """
    orig_shape = x.shape
    D = orig_shape[-1]
    x2 = x.reshape(-1, D)
    M = x2.shape[0]

    if compute_dtype is None:
        compute_dtype = x.dtype
    compute_dtype = jnp.dtype(compute_dtype)

    # Lane-dense feature dims (multiples of 128).
    D2 = 2 * D
    Dp = _round_up(D, 128)
    D2p = _round_up(D2, 128)

    # Row tile: as large as requested but clamped to the (8-aligned) row count.
    tm_eff = max(8, min(_round_up(tm, 8), _round_up(M, 8)))
    Mp = _round_up(M, tm_eff)

    # Pad inputs / params.  Zero padding keeps the math exact: padded W rows /
    # cols and padded biases contribute nothing, and the LayerNorm reduction
    # is masked to the first D lanes inside the kernel.
    x2p = jnp.pad(x2, ((0, Mp - M), (0, Dp - D)))
    w1p = jnp.pad(w1, ((0, Dp - D), (0, D2p - D2))).astype(compute_dtype)
    w2p = jnp.pad(w2, ((0, D2p - D2), (0, Dp - D))).astype(compute_dtype)
    b1p = jnp.pad(b1, (0, D2p - D2)).reshape(1, D2p).astype(jnp.float32)
    b2p = jnp.pad(b2, (0, Dp - D)).reshape(1, Dp).astype(jnp.float32)
    g_p = jnp.pad(gamma, (0, Dp - D)).reshape(1, Dp).astype(jnp.float32)
    be_p = jnp.pad(beta, (0, Dp - D)).reshape(1, Dp).astype(jnp.float32)

    grid = (Mp // tm_eff,)

    # Advisory cost estimate for XLA's scheduler.
    flops = 2 * Mp * Dp * D2p * 2                      # two matmuls
    transcendentals = Mp * D2p                         # sigmoid per h element
    x_bytes = jnp.dtype(x.dtype).itemsize
    c_bytes = compute_dtype.itemsize
    bytes_accessed = (2 * Mp * Dp * x_bytes            # x in + out
                      + (Dp * D2p + D2p * Dp) * c_bytes
                      + (D2p + 3 * Dp) * 4)
    cost = pl.CostEstimate(flops=flops, transcendentals=transcendentals,
                           bytes_accessed=bytes_accessed)

    # Rough resident-VMEM estimate (Pallas double-buffers every input).
    vmem_bytes = (2 * tm_eff * Dp * x_bytes            # x tile
                  + 2 * tm_eff * Dp * x_bytes          # out tile
                  + 2 * 2 * Dp * D2p * c_bytes         # W1 + W2
                  + 2 * (D2p + 3 * Dp) * 4             # biases / gamma / beta
                  + 2 * tm_eff * D2p * 4)              # f32 h intermediate
    compiler_kwargs = {}
    if vmem_bytes > 30 * 1024 * 1024:
        # Only raise the scoped-VMEM limit when actually needed (large D).
        compiler_kwargs["vmem_limit_bytes"] = int(min(vmem_bytes * 5 // 4,
                                                      96 * 1024 * 1024))

    kernel = functools.partial(skip_block_kernel, d_valid=D,
                               compute_dtype=compute_dtype)

    out = pl.pallas_call(
        kernel,
        out_shape=jax.ShapeDtypeStruct((Mp, Dp), x.dtype),
        grid_spec=pltpu.PrefetchScalarGridSpec(
            num_scalar_prefetch=0,
            grid=grid,
            in_specs=[
                pl.BlockSpec((tm_eff, Dp), lambda i: (i, 0)),   # x rows
                pl.BlockSpec((Dp, D2p), lambda i: (0, 0)),      # W1
                pl.BlockSpec((1, D2p), lambda i: (0, 0)),       # b1
                pl.BlockSpec((D2p, Dp), lambda i: (0, 0)),      # W2
                pl.BlockSpec((1, Dp), lambda i: (0, 0)),        # b2
                pl.BlockSpec((1, Dp), lambda i: (0, 0)),        # gamma
                pl.BlockSpec((1, Dp), lambda i: (0, 0)),        # beta
            ],
            out_specs=pl.BlockSpec((tm_eff, Dp), lambda i: (i, 0)),
        ),
        compiler_params=pltpu.CompilerParams(
            dimension_semantics=("parallel",), **compiler_kwargs),
        cost_estimate=cost,
    )(x2p, w1p, b1p, w2p, b2p, g_p, be_p)

    return out[:M, :D].reshape(orig_shape)


def init_params(key, in_features):
    """Synthetic init matching the PyTorch module's parameter shapes.

    torch stores Linear weight as [out, in]; we store the transpose [in, out]
    so the kernel does x @ W directly.
    """
    d = in_features
    k1, k2, k3, k4 = jax.random.split(key, 4)
    lim1 = 1.0 / (d ** 0.5)
    lim2 = 1.0 / ((2 * d) ** 0.5)
    w1 = jax.random.uniform(k1, (d, 2 * d), jnp.float32, -lim1, lim1)
    b1 = jax.random.uniform(k2, (2 * d,), jnp.float32, -lim1, lim1)
    w2 = jax.random.uniform(k3, (2 * d, d), jnp.float32, -lim2, lim2)
    b2 = jax.random.uniform(k4, (d,), jnp.float32, -lim2, lim2)
    gamma = jnp.ones((d,), jnp.float32)
    beta = jnp.zeros((d,), jnp.float32)
    return w1, b1, w2, b2, gamma, beta


def reference(x, w1, b1, w2, b2, gamma, beta):
    h = x @ w1 + b1
    h = h * jax.nn.sigmoid(h)
    y = h @ w2 + b2
    y = y + x
    mean = jnp.mean(y, axis=-1, keepdims=True)
    var = jnp.mean((y - mean) ** 2, axis=-1, keepdims=True)
    return (y - mean) / jnp.sqrt(var + LN_EPS) * gamma + beta


if __name__ == "__main__":
    key = jax.random.PRNGKey(0)
    kx, kp = jax.random.split(key)

    batch, seq, hidden = 2, 8, 32       # small shapes implied by the module
    x = jax.random.normal(kx, (batch, seq, hidden), jnp.float32)
    params = init_params(kp, hidden)
    ref = reference(x, *params)

    # 1) f32 MXU path: exact match vs. the pure-JAX reference.
    out = skip_block(x, *params)
    out = jax.block_until_ready(out)
    assert out.shape == x.shape and out.dtype == x.dtype
    assert jnp.allclose(out, ref, atol=1e-5, rtol=1e-5), "f32 mismatch vs ref"

    # 2) bf16-operand MXU path (f32 accumulation / SiLU / LayerNorm).
    out_bf16 = skip_block(x, *params, compute_dtype=jnp.bfloat16)
    out_bf16 = jax.block_until_ready(out_bf16)
    assert out_bf16.shape == x.shape and out_bf16.dtype == x.dtype
    assert jnp.allclose(out_bf16, ref, atol=7.5e-2, rtol=7.5e-2), \
        "bf16 mismatch vs ref"

    print("KERNEL_OK")
</pallas_src>

<mosaic_0001>
module attributes {stable_mosaic.version = 11 : i64} {
  func.func @skip_block_kernel(%arg0: i32, %arg1: memref<16x128xf32, #tpu.memory_space<vmem>>, %arg2: memref<128x128xf32, #tpu.memory_space<vmem>>, %arg3: memref<1x128xf32, #tpu.memory_space<vmem>>, %arg4: memref<128x128xf32, #tpu.memory_space<vmem>>, %arg5: memref<1x128xf32, #tpu.memory_space<vmem>>, %arg6: memref<1x128xf32, #tpu.memory_space<vmem>>, %arg7: memref<1x128xf32, #tpu.memory_space<vmem>>, %arg8: memref<16x128xf32, #tpu.memory_space<vmem>>) attributes {dimension_semantics = [#tpu.dimension_semantics<parallel>], iteration_bounds = array<i64: 1>, scalar_prefetch = 0 : i64, scratch_operands = 0 : i64, tpu.core_type = #tpu.core_type<tc>, window_params = [{transform_indices = @transform_0, window_bounds = array<i64: 16, 128>}, {pipeline_mode = #tpu.pipeline_mode<synchronous>, transform_indices = @transform_1, window_bounds = array<i64: 128, 128>}, {pipeline_mode = #tpu.pipeline_mode<synchronous>, transform_indices = @transform_2, window_bounds = array<i64: 1, 128>}, {pipeline_mode = #tpu.pipeline_mode<synchronous>, transform_indices = @transform_3, window_bounds = array<i64: 128, 128>}, {pipeline_mode = #tpu.pipeline_mode<synchronous>, transform_indices = @transform_4, window_bounds = array<i64: 1, 128>}, {pipeline_mode = #tpu.pipeline_mode<synchronous>, transform_indices = @transform_5, window_bounds = array<i64: 1, 128>}, {pipeline_mode = #tpu.pipeline_mode<synchronous>, transform_indices = @transform_6, window_bounds = array<i64: 1, 128>}, {transform_indices = @transform_7, window_bounds = array<i64: 16, 128>}]} {
    %c0 = arith.constant 0 : index
    %c0_0 = arith.constant 0 : index
    %0 = vector.load %arg1[%c0, %c0_0] : memref<16x128xf32, #tpu.memory_space<vmem>>, vector<16x128xf32>
    %c0_1 = arith.constant 0 : index
    %c0_2 = arith.constant 0 : index
    %1 = vector.load %arg2[%c0_1, %c0_2] : memref<128x128xf32, #tpu.memory_space<vmem>>, vector<128x128xf32>
    %cst = arith.constant dense<0.000000e+00> : vector<16x128xf32>
    %2 = tpu.matmul %0, %1, %cst {dimension_numbers = #tpu.dot_dimension_numbers<[1], [0], [0], [1], [0, 0, 1, 1], [], []>} : vector<16x128xf32>, vector<128x128xf32>, vector<16x128xf32> -> vector<16x128xf32>
    %c0_3 = arith.constant 0 : index
    %c0_4 = arith.constant 0 : index
    %3 = vector.load %arg3[%c0_3, %c0_4] : memref<1x128xf32, #tpu.memory_space<vmem>>, vector<1x128xf32>
    %4 = vector.broadcast %3 : vector<1x128xf32> to vector<16x128xf32>
    %5 = arith.addf %2, %4 : vector<16x128xf32>
    %6 = arith.negf %5 : vector<16x128xf32>
    %7 = math.exp %6 : vector<16x128xf32>
    %cst_5 = arith.constant 1.000000e+00 : f32
    %8 = vector.broadcast %cst_5 : f32 to vector<16x128xf32>
    %9 = arith.addf %8, %7 : vector<16x128xf32>
    %10 = arith.divf %8, %9 : vector<16x128xf32>
    %11 = arith.mulf %5, %10 : vector<16x128xf32>
    %c0_6 = arith.constant 0 : index
    %c0_7 = arith.constant 0 : index
    %12 = vector.load %arg4[%c0_6, %c0_7] : memref<128x128xf32, #tpu.memory_space<vmem>>, vector<128x128xf32>
    %cst_8 = arith.constant dense<0.000000e+00> : vector<16x128xf32>
    %13 = tpu.matmul %11, %12, %cst_8 {dimension_numbers = #tpu.dot_dimension_numbers<[1], [0], [0], [1], [0, 0, 1, 1], [], []>} : vector<16x128xf32>, vector<128x128xf32>, vector<16x128xf32> -> vector<16x128xf32>
    %c0_9 = arith.constant 0 : index
    %c0_10 = arith.constant 0 : index
    %14 = vector.load %arg5[%c0_9, %c0_10] : memref<1x128xf32, #tpu.memory_space<vmem>>, vector<1x128xf32>
    %15 = vector.broadcast %14 : vector<1x128xf32> to vector<16x128xf32>
    %16 = arith.addf %13, %15 : vector<16x128xf32>
    %17 = arith.addf %16, %0 : vector<16x128xf32>
    %18 = tpu.iota {dimensions = array<i32: 1>} : vector<16x128xi32>
    %c32_i32 = arith.constant 32 : i32
    %19 = vector.broadcast %c32_i32 : i32 to vector<16x128xi32>
    %20 = arith.cmpi slt, %18, %19 : vector<16x128xi32>
    %cst_11 = arith.constant 0.000000e+00 : f32
    %21 = vector.broadcast %cst_11 : f32 to vector<16x128xf32>
    %22 = arith.select %20, %17, %21 : vector<16x128xi1>, vector<16x128xf32>
    %cst_12 = arith.constant dense<0.000000e+00> : vector<16xf32>
    %23 = vector.multi_reduction <add>, %22, %cst_12 [1] : vector<16x128xf32> to vector<16xf32>
    %24 = vector.shape_cast %23 : vector<16xf32> to vector<16x1xf32>
    %cst_13 = arith.constant 3.125000e-02 : f32
    %25 = vector.broadcast %cst_13 : f32 to vector<16x1xf32>
    %26 = arith.mulf %24, %25 : vector<16x1xf32>
    %27 = vector.broadcast %26 : vector<16x1xf32> to vector<16x128xf32>
    %28 = arith.subf %22, %27 : vector<16x128xf32>
    %cst_14 = arith.constant 0.000000e+00 : f32
    %29 = vector.broadcast %cst_14 : f32 to vector<16x128xf32>
    %30 = arith.select %20, %28, %29 : vector<16x128xi1>, vector<16x128xf32>
    %31 = arith.mulf %30, %30 : vector<16x128xf32>
    %cst_15 = arith.constant dense<0.000000e+00> : vector<16xf32>
    %32 = vector.multi_reduction <add>, %31, %cst_15 [1] : vector<16x128xf32> to vector<16xf32>
    %33 = vector.shape_cast %32 : vector<16xf32> to vector<16x1xf32>
    %cst_16 = arith.constant 3.125000e-02 : f32
    %34 = vector.broadcast %cst_16 : f32 to vector<16x1xf32>
    %35 = arith.mulf %33, %34 : vector<16x1xf32>
    %cst_17 = arith.constant 9.99999974E-6 : f32
    %36 = vector.broadcast %cst_17 : f32 to vector<16x1xf32>
    %37 = arith.addf %35, %36 : vector<16x1xf32>
    %38 = math.rsqrt %37 : vector<16x1xf32>
    %39 = vector.broadcast %38 : vector<16x1xf32> to vector<16x128xf32>
    %40 = arith.mulf %30, %39 : vector<16x128xf32>
    %c0_18 = arith.constant 0 : index
    %c0_19 = arith.constant 0 : index
    %41 = vector.load %arg6[%c0_18, %c0_19] : memref<1x128xf32, #tpu.memory_space<vmem>>, vector<1x128xf32>
    %42 = vector.broadcast %41 : vector<1x128xf32> to vector<16x128xf32>
    %43 = arith.mulf %40, %42 : vector<16x128xf32>
    %c0_20 = arith.constant 0 : index
    %c0_21 = arith.constant 0 : index
    %44 = vector.load %arg7[%c0_20, %c0_21] : memref<1x128xf32, #tpu.memory_space<vmem>>, vector<1x128xf32>
    %45 = vector.broadcast %44 : vector<1x128xf32> to vector<16x128xf32>
    %46 = arith.addf %43, %45 : vector<16x128xf32>
    %c0_22 = arith.constant 0 : index
    %c0_23 = arith.constant 0 : index
    %47 = vector.load %arg8[%c0_22, %c0_23] : memref<16x128xf32, #tpu.memory_space<vmem>>, vector<16x128xf32>
    tpu.vector_store %arg8[%c0_22, %c0_23], %46 {strides = array<i32>} : memref<16x128xf32, #tpu.memory_space<vmem>>, vector<16x128xf32>,
    return
  }
  func.func @transform_0(%arg0: i32) -> (i32, i32) {
    %c0_i32 = arith.constant 0 : i32
    %c0_i32_0 = arith.constant 0 : i32
    return %arg0, %c0_i32 : i32, i32
  }
  func.func @transform_1(%arg0: i32) -> (i32, i32) {
    %c0_i32 = arith.constant 0 : i32
    %c0_i32_0 = arith.constant 0 : i32
    %c0_i32_1 = arith.constant 0 : i32
    return %c0_i32, %c0_i32_0 : i32, i32
  }
  func.func @transform_2(%arg0: i32) -> (i32, i32) {
    %c0_i32 = arith.constant 0 : i32
    %c0_i32_0 = arith.constant 0 : i32
    %c0_i32_1 = arith.constant 0 : i32
    return %c0_i32, %c0_i32_0 : i32, i32
  }
  func.func @transform_3(%arg0: i32) -> (i32, i32) {
    %c0_i32 = arith.constant 0 : i32
    %c0_i32_0 = arith.constant 0 : i32
    %c0_i32_1 = arith.constant 0 : i32
    return %c0_i32, %c0_i32_0 : i32, i32
  }
  func.func @transform_4(%arg0: i32) -> (i32, i32) {
    %c0_i32 = arith.constant 0 : i32
    %c0_i32_0 = arith.constant 0 : i32
    %c0_i32_1 = arith.constant 0 : i32
    return %c0_i32, %c0_i32_0 : i32, i32
  }
  func.func @transform_5(%arg0: i32) -> (i32, i32) {
    %c0_i32 = arith.constant 0 : i32
    %c0_i32_0 = arith.constant 0 : i32
    %c0_i32_1 = arith.constant 0 : i32
    return %c0_i32, %c0_i32_0 : i32, i32
  }
  func.func @transform_6(%arg0: i32) -> (i32, i32) {
    %c0_i32 = arith.constant 0 : i32
    %c0_i32_0 = arith.constant 0 : i32
    %c0_i32_1 = arith.constant 0 : i32
    return %c0_i32, %c0_i32_0 : i32, i32
  }
  func.func @transform_7(%arg0: i32) -> (i32, i32) {
    %c0_i32 = arith.constant 0 : i32
    %c0_i32_0 = arith.constant 0 : i32
    return %arg0, %c0_i32 : i32, i32
  }
}

</mosaic_0001>

<bundles_post_ra>
// kernel: skip_block.1
= control target key start
LH: loop header
LB: loop body
LE: loop exit
PB: predicated region body
PF: predicated region fallthrough
CT: control target
= control target key end

     0   :  { %s653_s1 = inlined_call_operand.vmem [shape: f32[128,128], index: 1, kind: input, shape index: {}]   ;;  %s654_s0 = inlined_call_operand.vmem [shape: f32[16,128], index: 0, kind: input, shape index: {}]   ;;  %s655_s3 = inlined_call_operand.vmem [shape: f32[128,128], index: 3, kind: input, shape index: {}]   ;;  %s656_s2 = inlined_call_operand.vmem [shape: f32[1,128], index: 2, kind: input, shape index: {}]   ;;  %s657_s4 = inlined_call_operand.vmem [shape: f32[1,128], index: 4, kind: input, shape index: {}]   ;;  %s658_s5 = inlined_call_operand.vmem [shape: f32[1,128], index: 5, kind: input, shape index: {}]   ;;  %s659_s6 = inlined_call_operand.vmem [shape: f32[1,128], index: 6, kind: input, shape index: {}]   ;;  %s660_s7 = inlined_call_operand.vmem [shape: f32[16,128], index: 7, kind: output, shape index: {}]  }
   0x1   :  { %v28_v0 = vld [vmem:[%s653_s1] sm:$0xff]  ;;  %v29_v1 = vld [vmem:[%s653_s1 + $0x8] sm:$0xff]  ;;  %v30_v2 = vld [vmem:[%s653_s1 + $0x10] sm:$0xff] }
   0x2   :  { %v405_v3 = vpack.c.bf16 %v29_v1, %v28_v0  ;;  %v31_v4 = vld [vmem:[%s653_s1 + $0x18] sm:$0xff]  ;;  %v32_v6 = vld [vmem:[%s653_s1 + $0x20] sm:$0xff]  ;;  %v33_v7 = vld [vmem:[%s653_s1 + $0x28] sm:$0xff]  ;;  %v240_v1 = vlaneseq }
   0x3   :  { %v409_v5 = vpack.c.bf16 %v31_v4, %v30_v2  ;;  %v413_v8 = vpack.c.bf16 %v33_v7, %v32_v6  ;;  %v542_v9 = vld [vmem:[%s654_s0] sm:$0xff]  ;;  %v34_v10 = vld [vmem:[%s653_s1 + $0x30] sm:$0xff]  ;;  %v35_v11 = vld [vmem:[%s653_s1 + $0x38] sm:$0xff] }
   0x4   :  { %406 = vmatprep.subr.bf16.mxu0 %v405_v3  ;;  %367 = vmatprep.mubr.f32.mxu0 %v542_v9  ;;  %v417_v12 = vpack.c.bf16 %v35_v11, %v34_v10  ;;  %v36_v13 = vld [vmem:[%s653_s1 + $0x40] sm:$0xff]  ;;  %v37_v14 = vld [vmem:[%s653_s1 + $0x48] sm:$0xff]  ;;  %v38_v16 = vld [vmem:[%s653_s1 + $0x50] sm:$0xff] }
   0x5   :  { %408 = vmatpush3.bf16.msra.mxu0 %v405_v3  ;;  %v421_v15 = vpack.c.bf16 %v37_v14, %v36_v13  ;;  %v39_v17 = vld [vmem:[%s653_s1 + $0x58] sm:$0xff]  ;;  %v40_v19 = vld [vmem:[%s653_s1 + $0x60] sm:$0xff]  ;;  %v41_v20 = vld [vmem:[%s653_s1 + $0x68] sm:$0xff]  ;;  %v241_v3 = vand.u32 127, %v240_v1 }
   0x6   :  { %410 = vmatprep.subr.bf16.mxu0 %v409_v5  ;;  %v425_v18 = vpack.c.bf16 %v39_v17, %v38_v16  ;;  %v429_v21 = vpack.c.bf16 %v41_v20, %v40_v19  ;;  %v42_v22 = vld [vmem:[%s653_s1 + $0x70] sm:$0xff]  ;;  %v43_v23 = vld [vmem:[%s653_s1 + $0x78] sm:$0xff]  ;;  %v578_v25 = vld [vmem:[%s654_s0 + $0x8] sm:$0xff] }
   0x7   :  { %v433_v24 = vpack.c.bf16 %v43_v23, %v42_v22  ;;  %v140_v26 = vld [vmem:[%s655_s3] sm:$0xff]  ;;  %v141_v27 = vld [vmem:[%s655_s3 + $0x8] sm:$0xff]  ;;  %v142_v29 = vld [vmem:[%s655_s3 + $0x10] sm:$0xff]  ;;  %vm242_vm0 = vcmp.lt.s32.totalorder %v241_v3, 32 }
   0x8   :  { %v437_v28 = vpack.c.bf16 %v141_v27, %v140_v26  ;;  %v143_v30 = vld [vmem:[%s655_s3 + $0x18] sm:$0xff]  ;;  %v144_v32 = vld [vmem:[%s655_s3 + $0x20] sm:$0xff]  ;;  %v145_v33 = vld [vmem:[%s655_s3 + $0x28] sm:$0xff] }
   0x9   :  { %412 = vmatpush3.bf16.msra.mxu0 %v409_v5  ;;  %v441_v31 = vpack.c.bf16 %v143_v30, %v142_v29  ;;  %v445_v34 = vpack.c.bf16 %v145_v33, %v144_v32  ;;  %v146_v35 = vld [vmem:[%s655_s3 + $0x30] sm:$0xff]  ;;  %v147_v36 = vld [vmem:[%s655_s3 + $0x38] sm:$0xff]  ;;  %v148_v38 = vld [vmem:[%s655_s3 + $0x40] sm:$0xff] }
   0xa   :  { %414 = vmatprep.subr.bf16.mxu0 %v413_v8  ;;  %438 = vmatprep.subr.bf16.mxu1 %v437_v28  ;;  %v449_v37 = vpack.c.bf16 %v147_v36, %v146_v35  ;;  %v149_v39 = vld [vmem:[%s655_s3 + $0x48] sm:$0xff]  ;;  %v150_v41 = vld [vmem:[%s655_s3 + $0x50] sm:$0xff]  ;;  %v151_v42 = vld [vmem:[%s655_s3 + $0x58] sm:$0xff] }
   0xb   :  { %440 = vmatpush3.bf16.msra.mxu1 %v437_v28  ;;  %v453_v40 = vpack.c.bf16 %v149_v39, %v148_v38  ;;  %v457_v43 = vpack.c.bf16 %v151_v42, %v150_v41  ;;  %v152_v44 = vld [vmem:[%s655_s3 + $0x60] sm:$0xff]  ;;  %v153_v45 = vld [vmem:[%s655_s3 + $0x68] sm:$0xff]  ;;  %v154_v47 = vld [vmem:[%s655_s3 + $0x70] sm:$0xff] }
   0xc   :  { %442 = vmatprep.subr.bf16.mxu1 %v441_v31  ;;  %v461_v46 = vpack.c.bf16 %v153_v45, %v152_v44  ;;  %v155_v48 = vld [vmem:[%s655_s3 + $0x78] sm:$0xff]  ;;  %v293_v50 = vld [vmem:[%s656_s2] ss:$0 sm:$0xff] }
   0xd   :  { %416 = vmatpush3.bf16.msra.mxu0 %v413_v8  ;;  %v465_v49 = vpack.c.bf16 %v155_v48, %v154_v47  ;;  %v296_v2 = vld [vmem:[%s657_s4] ss:$0 sm:$0xff] }
   0xe   :  { %418 = vmatprep.subr.bf16.mxu0 %v417_v12  ;;  %v297_v29 = vld [vmem:[%s658_s5] ss:$0 sm:$0xff] }
   0xf   :  { %444 = vmatpush3.bf16.msra.mxu1 %v441_v31  ;;  %v298_v31 = vld [vmem:[%s659_s6] ss:$0 sm:$0xff] }
  0x10   :  { %446 = vmatprep.subr.bf16.mxu1 %v445_v34 }
  0x11   :  { %420 = vmatpush3.bf16.msra.mxu0 %v417_v12 }
  0x12   :  { %422 = vmatprep.subr.bf16.mxu0 %v421_v15 }
  0x13   :  { %448 = vmatpush3.bf16.msra.mxu1 %v445_v34 }
  0x14   :  { %450 = vmatprep.subr.bf16.mxu1 %v449_v37 }
  0x15   :  { %424 = vmatpush3.bf16.msra.mxu0 %v421_v15 }
  0x16   :  { %426 = vmatprep.subr.bf16.mxu0 %v425_v18 }
  0x17   :  { %452 = vmatpush3.bf16.msra.mxu1 %v449_v37 }
  0x18   :  { %454 = vmatprep.subr.bf16.mxu1 %v453_v40 }
  0x19   :  { %428 = vmatpush3.bf16.msra.mxu0 %v425_v18 }
  0x1a   :  { %430 = vmatprep.subr.bf16.mxu0 %v429_v21 }
  0x1b   :  { %456 = vmatpush3.bf16.msra.mxu1 %v453_v40 }
  0x1c   :  { %458 = vmatprep.subr.bf16.mxu1 %v457_v43 }
  0x1d   :  { %432 = vmatpush3.bf16.msra.mxu0 %v429_v21 }
  0x1e   :  { %434 = vmatprep.subr.bf16.mxu0 %v433_v24 }
  0x1f   :  { %460 = vmatpush3.bf16.msra.mxu1 %v457_v43 }
  0x20   :  { %462 = vmatprep.subr.bf16.mxu1 %v461_v46 }
  0x21   :  { %436 = vmatpush3.bf16.msra.mxu0 %v433_v24 }
  0x23   :  { %464 = vmatpush3.bf16.msra.mxu1 %v461_v46 }
  0x24   :  { %368 = vmatmul.mubr.f32.vlgmr.msra.gmra.mrb[0].mxu0 %v578_v25  ;;  %466 = vmatprep.subr.bf16.mxu1 %v465_v49 }
  0x27   :  { %468 = vmatpush3.bf16.msra.mxu1 %v465_v49 }
  0xf7   :  { %v369_v51 = vpop.f32.mrb[0].mxu0 }
  0xf8   :  { %v123_v52 = vadd.f32 %v369_v51, %v293_v50  ;;  %v117_v53 = vpop.f32.mrb[1].mxu0 }
  0xf9   :  { %v118_v54 = vadd.f32 %v293_v50, %v117_v53 }
  0xfa   :  { %v295_v55 = vmul.f32 -1.442695, %v123_v52 }
  0xfb   :  { %v294_v56 = vmul.f32 -1.442695, %v118_v54 }
  0xfc   :  { %469 = vpow2.f32 %v295_v55 }
  0xfd   :  { %471 = vpow2.f32 %v294_v56 }
 0x106   :  { %v470_v57 = vpop.eup %469 }
 0x107   :  { %v472_v58 = vpop.eup %471  ;;  %v133_v59 = vadd.f32 1.0, %v470_v57 }
 0x108   :  { %v132_v60 = vadd.f32 1.0, %v472_v58 }
 0x109   :  { %473 = vrcp.f32 %v133_v59 }
 0x10a   :  { %475 = vrcp.f32 %v132_v60 }
 0x113   :  { %v474_v61 = vpop.eup %473 }
 0x114   :  { %v476_v62 = vpop.eup %475  ;;  %v139_v0 = vmul.f32 %v474_v61, %v123_v52 }
 0x115   :  { %v138_v63 = vmul.f32 %v476_v62, %v118_v54 }
 0x117   :  { %402 = vmatprep.mubr.f32.mxu1 %v138_v63 }
 0x118   :  { %403 = vmatmul.mubr.f32.vlgmr.msra.gmra.mrb[0].mxu1 %v139_v0 }
 0x1eb   :  { %v404_v4 = vpop.f32.mrb[0].mxu1 }
 0x1ec   :  { %v229_v5 = vpop.f32.mrb[1].mxu1  ;;  %v235_v6 = vadd.f32 %v404_v4, %v296_v2 }
 0x1ed   :  { %v230_v7 = vadd.f32 %v296_v2, %v229_v5 }
 0x1ee   :  { %v239_v11 = vadd.f32 %v235_v6, %v578_v25 }
 0x1ef   :  { %v238_v8 = vadd.f32 %v230_v7, %v542_v9 }
 0x1f0   :  { %v244_v12 = vsel %vm242_vm0, %v239_v11, 0.0 }
 0x1f1   :  { %v243_v10 = vsel %vm242_vm0, %v238_v8, 0.0 }
 0x1f2   :  { %245 = vadd.xlane.f32.xlu0 %v243_v10 }
 0x1f6   :  { %247 = vadd.xlane.f32.xlu0 %v244_v12 }
 0x27f   :  { %v246_v13 = vpop.xlane.xlu0 %245 }
 0x280   :  { %v249_v14 = vmul.f32 0.03125, %v246_v13 }
 0x282   :  { %v251_v15 = vsub.f32 %v243_v10, %v249_v14 }
 0x283   :  { %v248_v16 = vpop.xlane.xlu0 %247 }
 0x284   :  { %v250_v17 = vmul.f32 0.03125, %v248_v16  ;;  %v253_v18 = vsel %vm242_vm0, %v251_v15, 0.0 }
 0x285   :  { %v255_v19 = vmul.f32 %v253_v18, %v253_v18 }
 0x286   :  { %v252_v20 = vsub.f32 %v244_v12, %v250_v17 }
 0x287   :  { %257 = vadd.xlane.f32.xlu1 %v255_v19 }
 0x288   :  { %v254_v9 = vsel %vm242_vm0, %v252_v20, 0.0 }
 0x289   :  { %v256_v21 = vmul.f32 %v254_v9, %v254_v9 }
 0x28b   :  { %259 = vadd.xlane.f32.xlu1 %v256_v21 }
 0x314   :  { %v258_v22 = vpop.xlane.xlu1 %257 }
 0x315   :  { %v261_v23 = vmul.f32 0.03125, %v258_v22 }
 0x317   :  { %v263_v24 = vadd.f32 1e-05, %v261_v23 }
 0x318   :  { %v260_v25 = vpop.xlane.xlu1 %259 }
 0x319   :  { %477 = vrsqrt.f32 %v263_v24  ;;  %v262_v26 = vmul.f32 0.03125, %v260_v25 }
 0x31b   :  { %v264_v27 = vadd.f32 1e-05, %v262_v26 }
 0x31d   :  { %479 = vrsqrt.f32 %v264_v27 }
 0x323   :  { %v478_v28 = vpop.eup %477 }
 0x324   :  { %v267_v30 = vmul.f32 %v478_v28, %v253_v18 }
 0x326   :  { %v276_v32 = vmul.f32 %v297_v29, %v267_v30 }
 0x327   :  { %v480_v33 = vpop.eup %479 }
 0x328   :  { %v285_v34 = vadd.f32 %v298_v31, %v276_v32  ;;  %v268_v35 = vmul.f32 %v480_v33, %v254_v9 }
 0x32a   :  { %287 = vst [vmem:[%s660_s7] sm:$0xff] %v285_v34  ;;  %v277_v36 = vmul.f32 %v297_v29, %v268_v35 }
 0x32c   :  { %v286_v37 = vadd.f32 %v298_v31, %v277_v36 }
 0x32e   :  { %288 = vst [vmem:[%s660_s7 + $0x8] sm:$0xff] %v286_v37 }

</bundles_post_ra>
